<compile_context>
chip_gen: v7x
topology: tpu7x:2x2x1
jax: 0.10.0
libtpu: 0.0.40
codegen_flags: <defaults>
</compile_context>

<pallas_src>
import functools

import jax
import jax.numpy as jnp
from jax import lax
from jax.experimental import pallas as pl
from jax.experimental.pallas import tpu as pltpu

LAYER_NORM_EPS = 1e-12  # typical config.layer_norm_eps for BERT-style configs
_INV_SQRT2 = 0.7071067811865476


def _round_up(x, m):
    return ((x + m - 1) // m) * m


def _epilogue(y, b, g, beta, o_ref, *, out_dim, out_dim_padded, eps, approx_gelu):
    # y: (tile_rows, out_dim_padded) f32 matmul result (bias not yet added).
    y = y + b

    if approx_gelu:
        # tanh GELU lowers to the EUP (separate VLIW slot) -> cheaper than the
        # erf polynomial on the VPU, at ~1e-3 numeric difference.
        y = jax.nn.gelu(y, approximate=True)
    else:
        # Exact GELU (erf form), matching transformers ACT2FN["gelu"].
        y = 0.5 * y * (1.0 + lax.erf(y * jnp.float32(_INV_SQRT2)))

    # Padded output lanes are exactly zero here (zero W columns + zero bias ->
    # gelu(0) == 0), so the mean needs no masking.
    inv_d = jnp.float32(1.0 / out_dim)
    mean = jnp.sum(y, axis=-1, keepdims=True) * inv_d
    centered = y - mean
    if out_dim == out_dim_padded:
        var = jnp.sum(centered * centered, axis=-1, keepdims=True) * inv_d
    else:
        # Only the variance correction needs masking (padded lanes become
        # -mean after centering). Two-pass centered form keeps f32 accuracy.
        lane = lax.broadcasted_iota(jnp.int32, (1, out_dim_padded), 1)
        masked = jnp.where(lane < out_dim, centered, 0.0)
        var = jnp.sum(masked * masked, axis=-1, keepdims=True) * inv_d

    inv = lax.rsqrt(var + jnp.float32(eps))
    # gamma/beta padded lanes are 0, so padded output lanes stay 0.
    o_ref[...] = (centered * (inv * g) + beta).astype(o_ref.dtype)
    # Dropout: identity at inference time.
    # TODO(synk): training-mode dropout would use pltpu.prng_seed/prng_random_bits.


def _fc_kernel(x_ref, w_ref, b_ref, g_ref, beta_ref, o_ref, *scratch,
               out_dim, out_dim_padded, eps, approx_gelu, multi_k):
    # x_ref: (tile_rows, tile_k)    native dtype (f32 or bf16)
    # w_ref: (tile_k, out_dim_padded)
    # b_ref/g_ref/beta_ref: (1, out_dim_padded) f32
    # o_ref: (tile_rows, out_dim_padded)
    if multi_k:
        acc_ref = scratch[0]
        k = pl.program_id(1)

        @pl.when(k == 0)
        def _():
            acc_ref[...] = jnp.zeros_like(acc_ref)

        acc_ref[...] += jnp.dot(x_ref[...], w_ref[...],
                                preferred_element_type=jnp.float32)

        @pl.when(k == pl.num_programs(1) - 1)
        def _():
            _epilogue(acc_ref[...], b_ref[...], g_ref[...], beta_ref[...],
                      o_ref, out_dim=out_dim, out_dim_padded=out_dim_padded,
                      eps=eps, approx_gelu=approx_gelu)
    else:
        y = jnp.dot(x_ref[...], w_ref[...], preferred_element_type=jnp.float32)
        _epilogue(y, b_ref[...], g_ref[...], beta_ref[...], o_ref,
                  out_dim=out_dim, out_dim_padded=out_dim_padded,
                  eps=eps, approx_gelu=approx_gelu)


def prepare_fc_params(weight, bias, gamma, beta, *, compute_dtype=None):
    """One-time parameter prep: transpose W, pad the lane dim to 128.

    weight: [output_dim, input_dim] (PyTorch Linear layout).
    compute_dtype: optionally cast the weight (e.g. jnp.bfloat16) for faster
      MXU throughput; accumulation stays f32 inside the kernel.
    """
    output_dim, _ = weight.shape
    out_pad = _round_up(output_dim, 128)
    w_t = jnp.transpose(weight)  # [input_dim, output_dim]
    if compute_dtype is not None:
        w_t = w_t.astype(compute_dtype)
    if out_pad != output_dim:
        pad = out_pad - output_dim
        w_t = jnp.pad(w_t, ((0, 0), (0, pad)))
        bias = jnp.pad(bias, (0, pad))
        gamma = jnp.pad(gamma, (0, pad))
        beta = jnp.pad(beta, (0, pad))
    b2d = bias.reshape(1, out_pad).astype(jnp.float32)
    g2d = gamma.reshape(1, out_pad).astype(jnp.float32)
    beta2d = beta.reshape(1, out_pad).astype(jnp.float32)
    return w_t, b2d, g2d, beta2d, output_dim


def _vmem_capacity_bytes():
    try:
        return int(pltpu.get_tpu_info().vmem_capacity_bytes)
    except Exception:
        return 128 << 20  # v5e/v6e physical VMEM


def _choose_tile_k(input_dim, out_pad, w_itemsize, vmem_cap):
    """K-tile the reduction when the resident padded weight would be too big."""
    budget = vmem_cap // 4
    if input_dim * out_pad * w_itemsize <= budget:
        return input_dim
    for cand in (4096, 2048, 1024, 512, 256, 128):
        if cand < input_dim and input_dim % cand == 0:
            if 2 * cand * out_pad * w_itemsize <= budget:  # double-buffered
                return cand
    # TODO(synk): pad input_dim when it has no 128-multiple divisor; falls back
    # to a resident weight (may overflow VMEM for very large weights on v7x).
    return input_dim


def fully_connected_layer(x, params, *, tile_rows=None, eps=LAYER_NORM_EPS,
                          approx_gelu=False):
    """x: [batch, seq, input_dim]; params from prepare_fc_params."""
    w_t, b2d, g2d, beta2d, output_dim = params
    batch, seq, input_dim = x.shape
    out_pad = w_t.shape[1]
    n_rows = batch * seq
    x2d = x.reshape(n_rows, input_dim)

    vmem_cap = _vmem_capacity_bytes()
    x_it = jnp.dtype(x.dtype).itemsize
    w_it = jnp.dtype(w_t.dtype).itemsize

    # Row tile: multiple of the dtype's sublane pack (8 f32 / 16 bf16 / 32 i8);
    # larger default on chips with 128 MiB VMEM (v5e/v6e), smaller on v7x.
    pack = max(8, 32 // x_it)
    if tile_rows is None:
        tile_rows = 512 if vmem_cap >= (100 << 20) else 256
    tile = _round_up(min(tile_rows, _round_up(n_rows, pack)), pack)

    # Optional K reduction tiling (bounds weight VMEM independent of input_dim).
    tile_k = _choose_tile_k(input_dim, out_pad, w_it, vmem_cap)
    num_k = input_dim // tile_k
    multi_k = num_k > 1

    # Ragged last row block is fine: its outputs are discarded by the slice.
    grid = (pl.cdiv(n_rows, tile), num_k)

    scratch_shapes = []
    if multi_k:
        scratch_shapes.append(pltpu.VMEM((tile, out_pad), jnp.float32))

    # VMEM budget: actual pipeline buffers + ~30% headroom, clamped to 75% of
    # the chip's physical VMEM (headroom for Mosaic internal scratch).
    w_bufs = 2 if multi_k else 1
    footprint = (2 * tile * tile_k * x_it              # double-buffered x
                 + w_bufs * tile_k * out_pad * w_it    # weight
                 + 2 * tile * out_pad * x_it           # double-buffered out
                 + 3 * out_pad * 4                     # params, single buffer
                 + (tile * out_pad * 4 if multi_k else 0))  # accumulator
    vmem_bytes = int(min(max(int(footprint * 1.3) + (1 << 20), 4 << 20),
                         int(0.75 * vmem_cap)))

    kernel = functools.partial(
        _fc_kernel, out_dim=output_dim, out_dim_padded=out_pad, eps=eps,
        approx_gelu=approx_gelu, multi_k=multi_k)

    def _run(use_single_buffering):
        # Grid-invariant blocks (constant index_map) do not need two pipeline
        # buffers: single-buffer the params, and the weight when K is untiled.
        const_mode = pl.Buffered(1) if use_single_buffering else None
        w_mode = const_mode if not multi_k else None

        def _spec(shape, index_map, mode=None):
            if mode is None:
                return pl.BlockSpec(shape, index_map)
            return pl.BlockSpec(shape, index_map, pipeline_mode=mode)

        in_specs = [
            _spec((tile, tile_k), lambda i, k: (i, k)),
            _spec((tile_k, out_pad), lambda i, k: (k, 0), w_mode),
            _spec((1, out_pad), lambda i, k: (0, 0), const_mode),
            _spec((1, out_pad), lambda i, k: (0, 0), const_mode),
            _spec((1, out_pad), lambda i, k: (0, 0), const_mode),
        ]
        out_specs = pl.BlockSpec((tile, out_pad), lambda i, k: (i, 0))

        return pl.pallas_call(
            kernel,
            out_shape=jax.ShapeDtypeStruct((n_rows, out_pad), x.dtype),
            grid_spec=pltpu.PrefetchScalarGridSpec(
                num_scalar_prefetch=0,
                grid=grid,
                in_specs=in_specs,
                out_specs=out_specs,
                scratch_shapes=scratch_shapes,
            ),
            compiler_params=pltpu.CompilerParams(
                dimension_semantics=("parallel", "arbitrary"),
                vmem_limit_bytes=vmem_bytes,
            ),
        )(x2d, w_t, b2d, g2d, beta2d)

    try:
        out = _run(True)
    except Exception:
        # Fallback for jax versions where pipeline_mode / Buffered(1) is not
        # accepted; identical numerics, just default double-buffering.
        out = _run(False)

    return out[:, :output_dim].reshape(batch, seq, output_dim)


def _reference(x, weight, bias, gamma, beta):
    y = jnp.einsum("bsi,oi->bso", x, weight) + bias
    y = 0.5 * y * (1.0 + lax.erf(y / jnp.sqrt(2.0)))
    mean = jnp.mean(y, axis=-1, keepdims=True)
    var = jnp.mean((y - mean) ** 2, axis=-1, keepdims=True)
    y = (y - mean) * lax.rsqrt(var + LAYER_NORM_EPS) * gamma + beta
    return y


if __name__ == "__main__":
    # Small shapes consistent with the module: batch=2, seq=8, hidden 32 -> 64.
    batch, seq, input_dim, output_dim = 2, 8, 32, 64

    key = jax.random.PRNGKey(0)
    kx, kw, kb, kg, kbe = jax.random.split(key, 5)

    x = jax.random.normal(kx, (batch, seq, input_dim), dtype=jnp.float32)
    # Deterministic parameter init (synthetic; not a checkpoint load).
    weight = jax.random.normal(kw, (output_dim, input_dim), dtype=jnp.float32) * 0.05
    bias = jax.random.normal(kb, (output_dim,), dtype=jnp.float32) * 0.01
    gamma = jnp.ones((output_dim,), dtype=jnp.float32) + 0.1 * jax.random.normal(
        kg, (output_dim,), dtype=jnp.float32
    )
    beta = 0.1 * jax.random.normal(kbe, (output_dim,), dtype=jnp.float32)

    # Parameter prep (transpose + lane padding) happens once, outside forward.
    # (compute_dtype=jnp.bfloat16 is available for bf16-MXU deployments.)
    params = prepare_fc_params(weight, bias, gamma, beta)

    out = fully_connected_layer(x, params)
    out = jax.block_until_ready(out)

    ref = _reference(x, weight, bias, gamma, beta)
    assert out.shape == (batch, seq, output_dim)
    assert jnp.allclose(out, ref, atol=1e-4, rtol=1e-4)

    print("KERNEL_OK")
</pallas_src>

<mosaic_0001>
module attributes {stable_mosaic.version = 11 : i64} {
  func.func @_fc_kernel(%arg0: i32, %arg1: i32, %arg2: memref<16x32xf32, #tpu.memory_space<vmem>>, %arg3: memref<32x128xf32, #tpu.memory_space<vmem>>, %arg4: memref<1x128xf32, #tpu.memory_space<vmem>>, %arg5: memref<1x128xf32, #tpu.memory_space<vmem>>, %arg6: memref<1x128xf32, #tpu.memory_space<vmem>>, %arg7: memref<16x128xf32, #tpu.memory_space<vmem>>) attributes {dimension_semantics = [#tpu.dimension_semantics<parallel>, #tpu.dimension_semantics<arbitrary>], iteration_bounds = array<i64: 1, 1>, scalar_prefetch = 0 : i64, scratch_operands = 0 : i64, tpu.core_type = #tpu.core_type<tc>, window_params = [{transform_indices = @transform_0, window_bounds = array<i64: 16, 32>}, {pipeline_mode = #tpu.pipeline_mode<synchronous>, transform_indices = @transform_1, window_bounds = array<i64: 32, 128>}, {pipeline_mode = #tpu.pipeline_mode<synchronous>, transform_indices = @transform_2, window_bounds = array<i64: 1, 128>}, {pipeline_mode = #tpu.pipeline_mode<synchronous>, transform_indices = @transform_3, window_bounds = array<i64: 1, 128>}, {pipeline_mode = #tpu.pipeline_mode<synchronous>, transform_indices = @transform_4, window_bounds = array<i64: 1, 128>}, {transform_indices = @transform_5, window_bounds = array<i64: 16, 128>}]} {
    %c0 = arith.constant 0 : index
    %c0_0 = arith.constant 0 : index
    %0 = vector.load %arg2[%c0, %c0_0] : memref<16x32xf32, #tpu.memory_space<vmem>>, vector<16x32xf32>
    %c0_1 = arith.constant 0 : index
    %c0_2 = arith.constant 0 : index
    %1 = vector.load %arg3[%c0_1, %c0_2] : memref<32x128xf32, #tpu.memory_space<vmem>>, vector<32x128xf32>
    %cst = arith.constant dense<0.000000e+00> : vector<16x128xf32>
    %2 = tpu.matmul %0, %1, %cst {dimension_numbers = #tpu.dot_dimension_numbers<[1], [0], [0], [1], [0, 0, 1, 1], [], []>} : vector<16x32xf32>, vector<32x128xf32>, vector<16x128xf32> -> vector<16x128xf32>
    %c0_3 = arith.constant 0 : index
    %c0_4 = arith.constant 0 : index
    %3 = vector.load %arg4[%c0_3, %c0_4] : memref<1x128xf32, #tpu.memory_space<vmem>>, vector<1x128xf32>
    %c0_5 = arith.constant 0 : index
    %c0_6 = arith.constant 0 : index
    %4 = vector.load %arg5[%c0_5, %c0_6] : memref<1x128xf32, #tpu.memory_space<vmem>>, vector<1x128xf32>
    %c0_7 = arith.constant 0 : index
    %c0_8 = arith.constant 0 : index
    %5 = vector.load %arg6[%c0_7, %c0_8] : memref<1x128xf32, #tpu.memory_space<vmem>>, vector<1x128xf32>
    %6 = vector.broadcast %3 : vector<1x128xf32> to vector<16x128xf32>
    %7 = arith.addf %2, %6 : vector<16x128xf32>
    %cst_9 = arith.constant 5.000000e-01 : f32
    %8 = vector.broadcast %cst_9 : f32 to vector<16x128xf32>
    %9 = arith.mulf %8, %7 : vector<16x128xf32>
    %cst_10 = arith.constant 0.707106769 : f32
    %10 = vector.broadcast %cst_10 : f32 to vector<16x128xf32>
    %11 = arith.mulf %7, %10 : vector<16x128xf32>
    %12 = math.erf %11 : vector<16x128xf32>
    %cst_11 = arith.constant 1.000000e+00 : f32
    %13 = vector.broadcast %cst_11 : f32 to vector<16x128xf32>
    %14 = arith.addf %13, %12 : vector<16x128xf32>
    %15 = arith.mulf %9, %14 : vector<16x128xf32>
    %cst_12 = arith.constant dense<0.000000e+00> : vector<16xf32>
    %16 = vector.multi_reduction <add>, %15, %cst_12 [1] : vector<16x128xf32> to vector<16xf32>
    %17 = vector.shape_cast %16 : vector<16xf32> to vector<16x1xf32>
    %cst_13 = arith.constant 1.562500e-02 : f32
    %18 = vector.broadcast %cst_13 : f32 to vector<16x1xf32>
    %19 = arith.mulf %17, %18 : vector<16x1xf32>
    %20 = vector.broadcast %19 : vector<16x1xf32> to vector<16x128xf32>
    %21 = arith.subf %15, %20 : vector<16x128xf32>
    %22 = tpu.iota {dimensions = array<i32: 1>} : vector<1x128xi32>
    %c64_i32 = arith.constant 64 : i32
    %23 = vector.broadcast %c64_i32 : i32 to vector<1x128xi32>
    %24 = arith.cmpi slt, %22, %23 : vector<1x128xi32>
    %cst_14 = arith.constant 0.000000e+00 : f32
    %25 = vector.shape_cast %24 : vector<1x128xi1> to vector<1x128xi1>
    %26 = vector.broadcast %25 : vector<1x128xi1> to vector<16x128xi1>
    %27 = vector.broadcast %cst_14 : f32 to vector<16x128xf32>
    %28 = arith.select %26, %21, %27 : vector<16x128xi1>, vector<16x128xf32>
    %29 = arith.mulf %28, %28 : vector<16x128xf32>
    %cst_15 = arith.constant dense<0.000000e+00> : vector<16xf32>
    %30 = vector.multi_reduction <add>, %29, %cst_15 [1] : vector<16x128xf32> to vector<16xf32>
    %31 = vector.shape_cast %30 : vector<16xf32> to vector<16x1xf32>
    %cst_16 = arith.constant 1.562500e-02 : f32
    %32 = vector.broadcast %cst_16 : f32 to vector<16x1xf32>
    %33 = arith.mulf %31, %32 : vector<16x1xf32>
    %cst_17 = arith.constant 9.99999996E-13 : f32
    %34 = vector.broadcast %cst_17 : f32 to vector<16x1xf32>
    %35 = arith.addf %33, %34 : vector<16x1xf32>
    %36 = math.rsqrt %35 : vector<16x1xf32>
    %37 = vector.broadcast %36 : vector<16x1xf32> to vector<16x128xf32>
    %38 = vector.broadcast %4 : vector<1x128xf32> to vector<16x128xf32>
    %39 = arith.mulf %37, %38 : vector<16x128xf32>
    %40 = arith.mulf %21, %39 : vector<16x128xf32>
    %41 = vector.broadcast %5 : vector<1x128xf32> to vector<16x128xf32>
    %42 = arith.addf %40, %41 : vector<16x128xf32>
    %c0_18 = arith.constant 0 : index
    %c0_19 = arith.constant 0 : index
    %43 = vector.load %arg7[%c0_18, %c0_19] : memref<16x128xf32, #tpu.memory_space<vmem>>, vector<16x128xf32>
    tpu.vector_store %arg7[%c0_18, %c0_19], %42 {strides = array<i32>} : memref<16x128xf32, #tpu.memory_space<vmem>>, vector<16x128xf32>,
    return
  }
  func.func @transform_0(%arg0: i32, %arg1: i32) -> (i32, i32) {
    %c0_i32 = arith.constant 0 : i32
    return %arg0, %arg1 : i32, i32
  }
  func.func @transform_1(%arg0: i32, %arg1: i32) -> (i32, i32) {
    %c0_i32 = arith.constant 0 : i32
    %c0_i32_0 = arith.constant 0 : i32
    return %arg1, %c0_i32 : i32, i32
  }
  func.func @transform_2(%arg0: i32, %arg1: i32) -> (i32, i32) {
    %c0_i32 = arith.constant 0 : i32
    %c0_i32_0 = arith.constant 0 : i32
    %c0_i32_1 = arith.constant 0 : i32
    return %c0_i32, %c0_i32_0 : i32, i32
  }
  func.func @transform_3(%arg0: i32, %arg1: i32) -> (i32, i32) {
    %c0_i32 = arith.constant 0 : i32
    %c0_i32_0 = arith.constant 0 : i32
    %c0_i32_1 = arith.constant 0 : i32
    return %c0_i32, %c0_i32_0 : i32, i32
  }
  func.func @transform_4(%arg0: i32, %arg1: i32) -> (i32, i32) {
    %c0_i32 = arith.constant 0 : i32
    %c0_i32_0 = arith.constant 0 : i32
    %c0_i32_1 = arith.constant 0 : i32
    return %c0_i32, %c0_i32_0 : i32, i32
  }
  func.func @transform_5(%arg0: i32, %arg1: i32) -> (i32, i32) {
    %c0_i32 = arith.constant 0 : i32
    %c0_i32_0 = arith.constant 0 : i32
    return %arg0, %c0_i32 : i32, i32
  }
}

module attributes {stable_mosaic.version = 11 : i64} {
  func.func @_fc_kernel(%arg0: i32, %arg1: i32, %arg2: memref<16x32xf32, #tpu.memory_space<vmem>>, %arg3: memref<32x128xf32, #tpu.memory_space<vmem>>, %arg4: memref<1x128xf32, #tpu.memory_space<vmem>>, %arg5: memref<1x128xf32, #tpu.memory_space<vmem>>, %arg6: memref<1x128xf32, #tpu.memory_space<vmem>>, %arg7: memref<16x128xf32, #tpu.memory_space<vmem>>) attributes {dimension_semantics = [#tpu.dimension_semantics<parallel>, #tpu.dimension_semantics<arbitrary>], iteration_bounds = array<i64: 1, 1>, scalar_prefetch = 0 : i64, scratch_operands = 0 : i64, tpu.core_type = #tpu.core_type<tc>, window_params = [{transform_indices = @transform_0, window_bounds = array<i64: 16, 32>}, {transform_indices = @transform_1, window_bounds = array<i64: 32, 128>}, {pipeline_mode = #tpu.pipeline_mode<synchronous>, transform_indices = @transform_2, window_bounds = array<i64: 1, 128>}, {pipeline_mode = #tpu.pipeline_mode<synchronous>, transform_indices = @transform_3, window_bounds = array<i64: 1, 128>}, {pipeline_mode = #tpu.pipeline_mode<synchronous>, transform_indices = @transform_4, window_bounds = array<i64: 1, 128>}, {transform_indices = @transform_5, window_bounds = array<i64: 16, 128>}]} {
    %c0 = arith.constant 0 : index
    %c0_0 = arith.constant 0 : index
    %0 = vector.load %arg2[%c0, %c0_0] : memref<16x32xf32, #tpu.memory_space<vmem>>, vector<16x32xf32>
    %c0_1 = arith.constant 0 : index
    %c0_2 = arith.constant 0 : index
    %1 = vector.load %arg3[%c0_1, %c0_2] : memref<32x128xf32, #tpu.memory_space<vmem>>, vector<32x128xf32>
    %cst = arith.constant dense<0.000000e+00> : vector<16x128xf32>
    %2 = tpu.matmul %0, %1, %cst {dimension_numbers = #tpu.dot_dimension_numbers<[1], [0], [0], [1], [0, 0, 1, 1], [], []>} : vector<16x32xf32>, vector<32x128xf32>, vector<16x128xf32> -> vector<16x128xf32>
    %c0_3 = arith.constant 0 : index
    %c0_4 = arith.constant 0 : index
    %3 = vector.load %arg4[%c0_3, %c0_4] : memref<1x128xf32, #tpu.memory_space<vmem>>, vector<1x128xf32>
    %c0_5 = arith.constant 0 : index
    %c0_6 = arith.constant 0 : index
    %4 = vector.load %arg5[%c0_5, %c0_6] : memref<1x128xf32, #tpu.memory_space<vmem>>, vector<1x128xf32>
    %c0_7 = arith.constant 0 : index
    %c0_8 = arith.constant 0 : index
    %5 = vector.load %arg6[%c0_7, %c0_8] : memref<1x128xf32, #tpu.memory_space<vmem>>, vector<1x128xf32>
    %6 = vector.broadcast %3 : vector<1x128xf32> to vector<16x128xf32>
    %7 = arith.addf %2, %6 : vector<16x128xf32>
    %cst_9 = arith.constant 5.000000e-01 : f32
    %8 = vector.broadcast %cst_9 : f32 to vector<16x128xf32>
    %9 = arith.mulf %8, %7 : vector<16x128xf32>
    %cst_10 = arith.constant 0.707106769 : f32
    %10 = vector.broadcast %cst_10 : f32 to vector<16x128xf32>
    %11 = arith.mulf %7, %10 : vector<16x128xf32>
    %12 = math.erf %11 : vector<16x128xf32>
    %cst_11 = arith.constant 1.000000e+00 : f32
    %13 = vector.broadcast %cst_11 : f32 to vector<16x128xf32>
    %14 = arith.addf %13, %12 : vector<16x128xf32>
    %15 = arith.mulf %9, %14 : vector<16x128xf32>
    %cst_12 = arith.constant dense<0.000000e+00> : vector<16xf32>
    %16 = vector.multi_reduction <add>, %15, %cst_12 [1] : vector<16x128xf32> to vector<16xf32>
    %17 = vector.shape_cast %16 : vector<16xf32> to vector<16x1xf32>
    %cst_13 = arith.constant 1.562500e-02 : f32
    %18 = vector.broadcast %cst_13 : f32 to vector<16x1xf32>
    %19 = arith.mulf %17, %18 : vector<16x1xf32>
    %20 = vector.broadcast %19 : vector<16x1xf32> to vector<16x128xf32>
    %21 = arith.subf %15, %20 : vector<16x128xf32>
    %22 = tpu.iota {dimensions = array<i32: 1>} : vector<1x128xi32>
    %c64_i32 = arith.constant 64 : i32
    %23 = vector.broadcast %c64_i32 : i32 to vector<1x128xi32>
    %24 = arith.cmpi slt, %22, %23 : vector<1x128xi32>
    %cst_14 = arith.constant 0.000000e+00 : f32
    %25 = vector.shape_cast %24 : vector<1x128xi1> to vector<1x128xi1>
    %26 = vector.broadcast %25 : vector<1x128xi1> to vector<16x128xi1>
    %27 = vector.broadcast %cst_14 : f32 to vector<16x128xf32>
    %28 = arith.select %26, %21, %27 : vector<16x128xi1>, vector<16x128xf32>
    %29 = arith.mulf %28, %28 : vector<16x128xf32>
    %cst_15 = arith.constant dense<0.000000e+00> : vector<16xf32>
    %30 = vector.multi_reduction <add>, %29, %cst_15 [1] : vector<16x128xf32> to vector<16xf32>
    %31 = vector.shape_cast %30 : vector<16xf32> to vector<16x1xf32>
    %cst_16 = arith.constant 1.562500e-02 : f32
    %32 = vector.broadcast %cst_16 : f32 to vector<16x1xf32>
    %33 = arith.mulf %31, %32 : vector<16x1xf32>
    %cst_17 = arith.constant 9.99999996E-13 : f32
    %34 = vector.broadcast %cst_17 : f32 to vector<16x1xf32>
    %35 = arith.addf %33, %34 : vector<16x1xf32>
    %36 = math.rsqrt %35 : vector<16x1xf32>
    %37 = vector.broadcast %36 : vector<16x1xf32> to vector<16x128xf32>
    %38 = vector.broadcast %4 : vector<1x128xf32> to vector<16x128xf32>
    %39 = arith.mulf %37, %38 : vector<16x128xf32>
    %40 = arith.mulf %21, %39 : vector<16x128xf32>
    %41 = vector.broadcast %5 : vector<1x128xf32> to vector<16x128xf32>
    %42 = arith.addf %40, %41 : vector<16x128xf32>
    %c0_18 = arith.constant 0 : index
    %c0_19 = arith.constant 0 : index
    %43 = vector.load %arg7[%c0_18, %c0_19] : memref<16x128xf32, #tpu.memory_space<vmem>>, vector<16x128xf32>
    tpu.vector_store %arg7[%c0_18, %c0_19], %42 {strides = array<i32>} : memref<16x128xf32, #tpu.memory_space<vmem>>, vector<16x128xf32>,
    return
  }
  func.func @transform_0(%arg0: i32, %arg1: i32) -> (i32, i32) {
    %c0_i32 = arith.constant 0 : i32
    return %arg0, %arg1 : i32, i32
  }
  func.func @transform_1(%arg0: i32, %arg1: i32) -> (i32, i32) {
    %c0_i32 = arith.constant 0 : i32
    %c0_i32_0 = arith.constant 0 : i32
    return %arg1, %c0_i32 : i32, i32
  }
  func.func @transform_2(%arg0: i32, %arg1: i32) -> (i32, i32) {
    %c0_i32 = arith.constant 0 : i32
    %c0_i32_0 = arith.constant 0 : i32
    %c0_i32_1 = arith.constant 0 : i32
    return %c0_i32, %c0_i32_0 : i32, i32
  }
  func.func @transform_3(%arg0: i32, %arg1: i32) -> (i32, i32) {
    %c0_i32 = arith.constant 0 : i32
    %c0_i32_0 = arith.constant 0 : i32
    %c0_i32_1 = arith.constant 0 : i32
    return %c0_i32, %c0_i32_0 : i32, i32
  }
  func.func @transform_4(%arg0: i32, %arg1: i32) -> (i32, i32) {
    %c0_i32 = arith.constant 0 : i32
    %c0_i32_0 = arith.constant 0 : i32
    %c0_i32_1 = arith.constant 0 : i32
    return %c0_i32, %c0_i32_0 : i32, i32
  }
  func.func @transform_5(%arg0: i32, %arg1: i32) -> (i32, i32) {
    %c0_i32 = arith.constant 0 : i32
    %c0_i32_0 = arith.constant 0 : i32
    return %arg0, %c0_i32 : i32, i32
  }
}

</mosaic_0001>

<bundles_post_ra>
// kernel: tpu_custom_call.1
= control target key start
LH: loop header
LB: loop body
LE: loop exit
PB: predicated region body
PF: predicated region fallthrough
CT: control target
= control target key end

     0   :  { %10 = vsyncpa [#allocation3], 0  ;;  %s425_s0 = inlined_call_operand.hbm [shape: f32[16,32], index: 0, kind: input, shape index: {}]   ;;  %s426_s1 = inlined_call_operand.hbm [shape: f32[32,128], index: 1, kind: input, shape index: {}]   ;;  %s427_s2 = inlined_call_operand.vmem [shape: f32[1,128], index: 2, kind: input, shape index: {}]   ;;  %s428_s3 = inlined_call_operand.vmem [shape: f32[1,128], index: 3, kind: input, shape index: {}]   ;;  %s429_s4 = inlined_call_operand.vmem [shape: f32[1,128], index: 4, kind: input, shape index: {}]   ;;  %s430_s5 = inlined_call_operand.hbm [shape: f32[16,128], index: 5, kind: output, shape index: {}]  }
   0x1   :  { %11 = vsyncpa [#allocation6], 0 }
   0x2   :  { %12 = vsyncpa [#allocation4], 0  ;;  %s336_s18 = smov [#allocation2]   ;;  %s264_s22 = scalar_lea.hbm %s425_s0, 256 }
   0x3   :  { %s18_s19 = sshll.u32 %s336_s18, 4  ;;  %p265_p0 = scmp.ne.s32.totalorder %s425_s0, %s264_s22  ;;  %s19_s19 = int_to_ptr.vmem [resolvable:$true] %s18_s19 }
   0x4   :  { %p268_p1 = scmp.lt.u32.totalorder %s264_s22, %s425_s0 }
   0x6   :  { %p270_p2 = pnand %p268_p1, %p265_p0 }
   0x8   :  { %273 = shalt.err (!%p270_p2)
}
   0x9   :  { %s274_s27 = scalar_lea.vmem %s19_s19, 256  ;;  %p279_p4 = scmp.lt.s32.totalorder %s19_s19, %s19_s19 }
   0xa   :  { %p275_p3 = scmp.ne.s32.totalorder %s19_s19, %s274_s27  ;;  %p280_p5 = scmp.lt.s32.totalorder %s274_s27, %s274_s27 }
   0xc   :  { %p281_p6 = por %p280_p5, %p279_p4 }
   0xe   :  { %p282_p7 = pnand %p281_p6, %p275_p3 }
  0x10   :  { %285 = shalt.err (!%p282_p7)
}
  0x11   :  { %s337_s28 = smov 128   ;;  %s338_s29 = smov 8  }
  0x12   :  { %24 = dma.hbm_to_vmem [thread:$0]  %s425_s0, 256, %s19_s19, [#allocation3], %s337_s28, %s337_s28, %s338_s29  }
  0x13   :  { %s339_s7 = smov [#allocation5]   ;;  %s286_s11 = scalar_lea.hbm %s426_s1, 512 }
  0x14   :  { %s30_s8 = sshll.u32 %s339_s7, 4  ;;  %p287_p8 = scmp.ne.s32.totalorder %s426_s1, %s286_s11  ;;  %s31_s8 = int_to_ptr.vmem [resolvable:$true] %s30_s8 }
  0x15   :  { %p290_p9 = scmp.lt.u32.totalorder %s286_s11, %s426_s1 }
  0x17   :  { %p292_p10 = pnand %p290_p9, %p287_p8 }
  0x19   :  { %295 = shalt.err (!%p292_p10)
}
  0x1a   :  { %s296_s16 = scalar_lea.vmem %s31_s8, 512  ;;  %p301_p12 = scmp.lt.s32.totalorder %s31_s8, %s31_s8 }
  0x1b   :  { %p297_p11 = scmp.ne.s32.totalorder %s31_s8, %s296_s16  ;;  %p302_p13 = scmp.lt.s32.totalorder %s296_s16, %s296_s16 }
  0x1d   :  { %p303_p0 = por %p302_p13, %p301_p12 }
  0x1f   :  { %p304_p1 = pnand %p303_p0, %p297_p11 }
  0x21   :  { %307 = shalt.err (!%p304_p1)
}
  0x22   :  { %36 = dma.hbm_to_vmem [thread:$0]  %s426_s1, 512, %s31_s8, [#allocation6], %s337_s28, %s337_s28, %s338_s29  }
  0x23   :  { %330 = dma.done.wait [#allocation3], 256  }
  0x24   :  { %331 = vsyncadd [#allocation3], 4294967040 }
  0x25   :  { %332 = dma.done.wait [#allocation6], 512  }
  0x26   :  { %333 = vsyncadd [#allocation6], 4294966784  ;;  %vm64_vm0 = vcmask 261120   ;;  %v51_v0 = vld [vmem:[#allocation5] sm:$0xff]  ;;  %v52_v1 = vld [vmem:[#allocation5 + $0x8] sm:$0xff]  ;;  %v164_v23 = vlaneseq  ;;  %s340_s22 = smov [#allocation7]  }
  0x27   :  { %v53_v2 = vld [vmem:[#allocation5 + $0x10] sm:$0xff]  ;;  %v243_v3 = vpack.c.bf16 %v52_v1, %v51_v0  ;;  %v54_v4 = vld [vmem:[#allocation5 + $0x18] sm:$0xff]  ;;  %s208_s23 = sshll.u32 %s340_s22, 4  ;;  %s209_s23 = int_to_ptr.vmem [resolvable:$true] %s208_s23 }
  0x28   :  { %v49_v5 = vld [vmem:[#allocation2] sm:$0xff]  ;;  %v247_v6 = vpack.c.bf16 %v54_v4, %v53_v2  ;;  %v50_v7 = vld [vmem:[#allocation2 + $0x8] sm:$0xff]  ;;  %v165_v24 = vand.u32 127, %v164_v23  ;;  %s308_s24 = scalar_lea.vmem %s209_s23, 256  ;;  %p313_p3 = scmp.lt.s32.totalorder %s209_s23, %s209_s23 }
  0x29   :  { %240 = vmatprep.mubr.msk.f32.mxu0 %vm64_vm0, %v49_v5  ;;  %244 = vmatprep.subr.bf16.mxu0 %v243_v3  ;;  %v221_v8 = vld [vmem:[%s427_s2] ss:$0 sm:$0xff]  ;;  %p309_p2 = scmp.ne.s32.totalorder %s209_s23, %s308_s24  ;;  %p314_p4 = scmp.lt.s32.totalorder %s308_s24, %s308_s24 }
  0x2a   :  { %246 = vmatpush3.bf16.msra.mxu0 %v243_v3  ;;  %vm166_vm1 = vcmp.lt.s32.totalorder %v165_v24, 64  ;;  %v224_v41 = vld [vmem:[%s428_s3] ss:$0 sm:$0xff] }
  0x2b   :  { %248 = vmatprep.subr.bf16.mxu0 %v247_v6  ;;  %v225_v44 = vld [vmem:[%s429_s4] ss:$0 sm:$0xff]  ;;  %p315_p5 = por %p314_p4, %p313_p3 }
  0x2d   :  { %p316_p6 = pnand %p315_p5, %p309_p2 }
  0x2e   :  { %250 = vmatpush3.bf16.msra.mxu0 %v247_v6 }
  0x31   :  { %241 = vmatmul.mubr.msk.f32.vlgmr.msra.gmra.mrb[0].mxu0 %vm64_vm0, %v50_v7 }
 0x104   :  { %v242_v9 = vpop.f32.mrb[0].mxu0 }
 0x105   :  { %v143_v10 = vadd.f32 %v242_v9, %v221_v8  ;;  %v137_v11 = vpop.f32.mrb[1].mxu0 }
 0x106   :  { %v138_v12 = vadd.f32 %v221_v8, %v137_v11 }
 0x107   :  { %v149_v13 = vmul.f32 0.70710677, %v143_v10  ;;  %v147_v21 = vmul.f32 0.5, %v143_v10 }
 0x108   :  { %v148_v14 = vmul.f32 0.70710677, %v138_v12  ;;  %v146_v17 = vmul.f32 0.5, %v138_v12 }
 0x109   :  { %256 = verf.f32 %v149_v13 }
 0x10a   :  { %258 = verf.f32 %v148_v14 }
 0x113   :  { %v257_v15 = vpop.eup %256 }
 0x114   :  { %v259_v16 = vpop.eup %258  ;;  %v153_v20 = vadd.f32 1.0, %v257_v15 }
 0x115   :  { %v152_v18 = vadd.f32 1.0, %v259_v16 }
 0x116   :  { %v155_v22 = vmul.f32 %v153_v20, %v147_v21 }
 0x117   :  { %v154_v19 = vmul.f32 %v152_v18, %v146_v17 }
 0x119   :  { %156 = vadd.xlane.f32.xlu0 %v154_v19 }
 0x11d   :  { %158 = vadd.xlane.f32.xlu0 %v155_v22 }
 0x1a6   :  { %v157_v25 = vpop.xlane.xlu0 %156 }
 0x1a7   :  { %v160_v26 = vmul.f32 0.015625, %v157_v25 }
 0x1a9   :  { %v162_v27 = vsub.f32 %v154_v19, %v160_v26 }
 0x1aa   :  { %v159_v28 = vpop.xlane.xlu0 %158 }
 0x1ab   :  { %v161_v29 = vmul.f32 0.015625, %v159_v28  ;;  %v169_v30 = vsel %vm166_vm1, %v162_v27, 0.0 }
 0x1ac   :  { %v171_v31 = vmul.f32 %v169_v30, %v169_v30 }
 0x1ad   :  { %v163_v32 = vsub.f32 %v155_v22, %v161_v29 }
 0x1ae   :  { %173 = vadd.xlane.f32.xlu1 %v171_v31 }
 0x1af   :  { %v170_v33 = vsel %vm166_vm1, %v163_v32, 0.0 }
 0x1b0   :  { %v172_v34 = vmul.f32 %v170_v33, %v170_v33 }
 0x1b2   :  { %175 = vadd.xlane.f32.xlu1 %v172_v34 }
 0x23b   :  { %v174_v35 = vpop.xlane.xlu1 %173 }
 0x23c   :  { %v177_v36 = vmul.f32 0.015625, %v174_v35 }
 0x23e   :  { %v179_v37 = vadd.f32 1e-12, %v177_v36 }
 0x23f   :  { %v176_v38 = vpop.xlane.xlu1 %175 }
 0x240   :  { %260 = vrsqrt.f32 %v179_v37  ;;  %v178_v39 = vmul.f32 0.015625, %v176_v38 }
 0x242   :  { %v180_v40 = vadd.f32 1e-12, %v178_v39 }
 0x244   :  { %262 = vrsqrt.f32 %v180_v40 }
 0x24a   :  { %v261_v42 = vpop.eup %260 }
 0x24b   :  { %v189_v43 = vmul.f32 %v261_v42, %v224_v41 }
 0x24d   :  { %v191_v45 = vmul.f32 %v189_v43, %v162_v27 }
 0x24e   :  { %v263_v46 = vpop.eup %262 }
 0x24f   :  { %v190_v47 = vmul.f32 %v263_v46, %v224_v41  ;;  %v199_v48 = vadd.f32 %v225_v44, %v191_v45 }
 0x251   :  { %v192_v49 = vmul.f32 %v190_v47, %v163_v32  ;;  %201 = vst [vmem:[#allocation7] sm:$0xff] %v199_v48 }
 0x253   :  { %v200_v50 = vadd.f32 %v225_v44, %v192_v49 }
 0x255   :  { %202 = vst [vmem:[#allocation7 + $0x8] sm:$0xff] %v200_v50 }
 0x256   :  { %319 = shalt.err (!%p316_p6)
}
 0x257   :  { %s320_s25 = scalar_lea.hbm %s430_s5, 256 }
 0x258   :  { %p321_p7 = scmp.ne.s32.totalorder %s430_s5, %s320_s25  ;;  %p324_p8 = scmp.lt.u32.totalorder %s320_s25, %s430_s5 }
 0x25a   :  { %p326_p9 = pnand %p324_p8, %p321_p7 }
 0x25c   :  { %329 = shalt.err (!%p326_p9)
}
 0x25d   :  { %214 = dma.vmem_to_hbm [thread:$0]  %s209_s23, 256, %s430_s5, [#allocation4], %s337_s28, %s337_s28, %s338_s29  }
 0x25e   :  { %334 = dma.done.wait [#allocation4], 256  }
 0x25f   :  { %335 = vsyncadd [#allocation4], 4294967040 }
 0x260   :  { %218 = vsyncpa [#allocation3], 1 }
 0x261   :  { %219 = vsyncpa [#allocation6], 1 }
 0x262   :  { %220 = vsyncpa [#allocation4], 1 }

// kernel: tpu_custom_call.1
= control target key start
LH: loop header
LB: loop body
LE: loop exit
PB: predicated region body
PF: predicated region fallthrough
CT: control target
= control target key end

     0   :  { %10 = vsyncpa [#allocation3], 0  ;;  %s425_s0 = inlined_call_operand.hbm [shape: f32[16,32], index: 0, kind: input, shape index: {}]   ;;  %s426_s1 = inlined_call_operand.hbm [shape: f32[32,128], index: 1, kind: input, shape index: {}]   ;;  %s427_s2 = inlined_call_operand.vmem [shape: f32[1,128], index: 2, kind: input, shape index: {}]   ;;  %s428_s3 = inlined_call_operand.vmem [shape: f32[1,128], index: 3, kind: input, shape index: {}]   ;;  %s429_s4 = inlined_call_operand.vmem [shape: f32[1,128], index: 4, kind: input, shape index: {}]   ;;  %s430_s5 = inlined_call_operand.hbm [shape: f32[16,128], index: 5, kind: output, shape index: {}]  }
   0x1   :  { %11 = vsyncpa [#allocation6], 0 }
   0x2   :  { %12 = vsyncpa [#allocation4], 0  ;;  %s336_s18 = smov [#allocation2]   ;;  %s264_s22 = scalar_lea.hbm %s425_s0, 256 }
   0x3   :  { %s18_s19 = sshll.u32 %s336_s18, 4  ;;  %p265_p0 = scmp.ne.s32.totalorder %s425_s0, %s264_s22  ;;  %s19_s19 = int_to_ptr.vmem [resolvable:$true] %s18_s19 }
   0x4   :  { %p268_p1 = scmp.lt.u32.totalorder %s264_s22, %s425_s0 }
   0x6   :  { %p270_p2 = pnand %p268_p1, %p265_p0 }
   0x8   :  { %273 = shalt.err (!%p270_p2)
}
   0x9   :  { %s274_s27 = scalar_lea.vmem %s19_s19, 256  ;;  %p279_p4 = scmp.lt.s32.totalorder %s19_s19, %s19_s19 }
   0xa   :  { %p275_p3 = scmp.ne.s32.totalorder %s19_s19, %s274_s27  ;;  %p280_p5 = scmp.lt.s32.totalorder %s274_s27, %s274_s27 }
   0xc   :  { %p281_p6 = por %p280_p5, %p279_p4 }
   0xe   :  { %p282_p7 = pnand %p281_p6, %p275_p3 }
  0x10   :  { %285 = shalt.err (!%p282_p7)
}
  0x11   :  { %s337_s28 = smov 128   ;;  %s338_s29 = smov 8  }
  0x12   :  { %24 = dma.hbm_to_vmem [thread:$0]  %s425_s0, 256, %s19_s19, [#allocation3], %s337_s28, %s337_s28, %s338_s29  }
  0x13   :  { %s339_s7 = smov [#allocation5]   ;;  %s286_s11 = scalar_lea.hbm %s426_s1, 512 }
  0x14   :  { %s30_s8 = sshll.u32 %s339_s7, 4  ;;  %p287_p8 = scmp.ne.s32.totalorder %s426_s1, %s286_s11  ;;  %s31_s8 = int_to_ptr.vmem [resolvable:$true] %s30_s8 }
  0x15   :  { %p290_p9 = scmp.lt.u32.totalorder %s286_s11, %s426_s1 }
  0x17   :  { %p292_p10 = pnand %p290_p9, %p287_p8 }
  0x19   :  { %295 = shalt.err (!%p292_p10)
}
  0x1a   :  { %s296_s16 = scalar_lea.vmem %s31_s8, 512  ;;  %p301_p12 = scmp.lt.s32.totalorder %s31_s8, %s31_s8 }
  0x1b   :  { %p297_p11 = scmp.ne.s32.totalorder %s31_s8, %s296_s16  ;;  %p302_p13 = scmp.lt.s32.totalorder %s296_s16, %s296_s16 }
  0x1d   :  { %p303_p0 = por %p302_p13, %p301_p12 }
  0x1f   :  { %p304_p1 = pnand %p303_p0, %p297_p11 }
  0x21   :  { %307 = shalt.err (!%p304_p1)
}
  0x22   :  { %36 = dma.hbm_to_vmem [thread:$0]  %s426_s1, 512, %s31_s8, [#allocation6], %s337_s28, %s337_s28, %s338_s29  }
  0x23   :  { %330 = dma.done.wait [#allocation3], 256  }
  0x24   :  { %331 = vsyncadd [#allocation3], 4294967040 }
  0x25   :  { %332 = dma.done.wait [#allocation6], 512  }
  0x26   :  { %333 = vsyncadd [#allocation6], 4294966784  ;;  %vm64_vm0 = vcmask 261120   ;;  %v51_v0 = vld [vmem:[#allocation5] sm:$0xff]  ;;  %v52_v1 = vld [vmem:[#allocation5 + $0x8] sm:$0xff]  ;;  %v164_v23 = vlaneseq  ;;  %s340_s22 = smov [#allocation7]  }
  0x27   :  { %v53_v2 = vld [vmem:[#allocation5 + $0x10] sm:$0xff]  ;;  %v243_v3 = vpack.c.bf16 %v52_v1, %v51_v0  ;;  %v54_v4 = vld [vmem:[#allocation5 + $0x18] sm:$0xff]  ;;  %s208_s23 = sshll.u32 %s340_s22, 4  ;;  %s209_s23 = int_to_ptr.vmem [resolvable:$true] %s208_s23 }
  0x28   :  { %v49_v5 = vld [vmem:[#allocation2] sm:$0xff]  ;;  %v247_v6 = vpack.c.bf16 %v54_v4, %v53_v2  ;;  %v50_v7 = vld [vmem:[#allocation2 + $0x8] sm:$0xff]  ;;  %v165_v24 = vand.u32 127, %v164_v23  ;;  %s308_s24 = scalar_lea.vmem %s209_s23, 256  ;;  %p313_p3 = scmp.lt.s32.totalorder %s209_s23, %s209_s23 }
  0x29   :  { %240 = vmatprep.mubr.msk.f32.mxu0 %vm64_vm0, %v49_v5  ;;  %244 = vmatprep.subr.bf16.mxu0 %v243_v3  ;;  %v221_v8 = vld [vmem:[%s427_s2] ss:$0 sm:$0xff]  ;;  %p309_p2 = scmp.ne.s32.totalorder %s209_s23, %s308_s24  ;;  %p314_p4 = scmp.lt.s32.totalorder %s308_s24, %s308_s24 }
  0x2a   :  { %246 = vmatpush3.bf16.msra.mxu0 %v243_v3  ;;  %vm166_vm1 = vcmp.lt.s32.totalorder %v165_v24, 64  ;;  %v224_v41 = vld [vmem:[%s428_s3] ss:$0 sm:$0xff] }
  0x2b   :  { %248 = vmatprep.subr.bf16.mxu0 %v247_v6  ;;  %v225_v44 = vld [vmem:[%s429_s4] ss:$0 sm:$0xff]  ;;  %p315_p5 = por %p314_p4, %p313_p3 }
  0x2d   :  { %p316_p6 = pnand %p315_p5, %p309_p2 }
  0x2e   :  { %250 = vmatpush3.bf16.msra.mxu0 %v247_v6 }
  0x31   :  { %241 = vmatmul.mubr.msk.f32.vlgmr.msra.gmra.mrb[0].mxu0 %vm64_vm0, %v50_v7 }
 0x104   :  { %v242_v9 = vpop.f32.mrb[0].mxu0 }
 0x105   :  { %v143_v10 = vadd.f32 %v242_v9, %v221_v8  ;;  %v137_v11 = vpop.f32.mrb[1].mxu0 }
 0x106   :  { %v138_v12 = vadd.f32 %v221_v8, %v137_v11 }
 0x107   :  { %v149_v13 = vmul.f32 0.70710677, %v143_v10  ;;  %v147_v21 = vmul.f32 0.5, %v143_v10 }
 0x108   :  { %v148_v14 = vmul.f32 0.70710677, %v138_v12  ;;  %v146_v17 = vmul.f32 0.5, %v138_v12 }
 0x109   :  { %256 = verf.f32 %v149_v13 }
 0x10a   :  { %258 = verf.f32 %v148_v14 }
 0x113   :  { %v257_v15 = vpop.eup %256 }
 0x114   :  { %v259_v16 = vpop.eup %258  ;;  %v153_v20 = vadd.f32 1.0, %v257_v15 }
 0x115   :  { %v152_v18 = vadd.f32 1.0, %v259_v16 }
 0x116   :  { %v155_v22 = vmul.f32 %v153_v20, %v147_v21 }
 0x117   :  { %v154_v19 = vmul.f32 %v152_v18, %v146_v17 }
 0x119   :  { %156 = vadd.xlane.f32.xlu0 %v154_v19 }
 0x11d   :  { %158 = vadd.xlane.f32.xlu0 %v155_v22 }
 0x1a6   :  { %v157_v25 = vpop.xlane.xlu0 %156 }
 0x1a7   :  { %v160_v26 = vmul.f32 0.015625, %v157_v25 }
 0x1a9   :  { %v162_v27 = vsub.f32 %v154_v19, %v160_v26 }
 0x1aa   :  { %v159_v28 = vpop.xlane.xlu0 %158 }
 0x1ab   :  { %v161_v29 = vmul.f32 0.015625, %v159_v28  ;;  %v169_v30 = vsel %vm166_vm1, %v162_v27, 0.0 }
 0x1ac   :  { %v171_v31 = vmul.f32 %v169_v30, %v169_v30 }
 0x1ad   :  { %v163_v32 = vsub.f32 %v155_v22, %v161_v29 }
 0x1ae   :  { %173 = vadd.xlane.f32.xlu1 %v171_v31 }
 0x1af   :  { %v170_v33 = vsel %vm166_vm1, %v163_v32, 0.0 }
 0x1b0   :  { %v172_v34 = vmul.f32 %v170_v33, %v170_v33 }
 0x1b2   :  { %175 = vadd.xlane.f32.xlu1 %v172_v34 }
 0x23b   :  { %v174_v35 = vpop.xlane.xlu1 %173 }
 0x23c   :  { %v177_v36 = vmul.f32 0.015625, %v174_v35 }
 0x23e   :  { %v179_v37 = vadd.f32 1e-12, %v177_v36 }
 0x23f   :  { %v176_v38 = vpop.xlane.xlu1 %175 }
 0x240   :  { %260 = vrsqrt.f32 %v179_v37  ;;  %v178_v39 = vmul.f32 0.015625, %v176_v38 }
 0x242   :  { %v180_v40 = vadd.f32 1e-12, %v178_v39 }
 0x244   :  { %262 = vrsqrt.f32 %v180_v40 }
 0x24a   :  { %v261_v42 = vpop.eup %260 }
 0x24b   :  { %v189_v43 = vmul.f32 %v261_v42, %v224_v41 }
 0x24d   :  { %v191_v45 = vmul.f32 %v189_v43, %v162_v27 }
 0x24e   :  { %v263_v46 = vpop.eup %262 }
 0x24f   :  { %v190_v47 = vmul.f32 %v263_v46, %v224_v41  ;;  %v199_v48 = vadd.f32 %v225_v44, %v191_v45 }
 0x251   :  { %v192_v49 = vmul.f32 %v190_v47, %v163_v32  ;;  %201 = vst [vmem:[#allocation7] sm:$0xff] %v199_v48 }
 0x253   :  { %v200_v50 = vadd.f32 %v225_v44, %v192_v49 }
 0x255   :  { %202 = vst [vmem:[#allocation7 + $0x8] sm:$0xff] %v200_v50 }
 0x256   :  { %319 = shalt.err (!%p316_p6)
}
 0x257   :  { %s320_s25 = scalar_lea.hbm %s430_s5, 256 }
 0x258   :  { %p321_p7 = scmp.ne.s32.totalorder %s430_s5, %s320_s25  ;;  %p324_p8 = scmp.lt.u32.totalorder %s320_s25, %s430_s5 }
 0x25a   :  { %p326_p9 = pnand %p324_p8, %p321_p7 }
 0x25c   :  { %329 = shalt.err (!%p326_p9)
}
 0x25d   :  { %214 = dma.vmem_to_hbm [thread:$0]  %s209_s23, 256, %s430_s5, [#allocation4], %s337_s28, %s337_s28, %s338_s29  }
 0x25e   :  { %334 = dma.done.wait [#allocation4], 256  }
 0x25f   :  { %335 = vsyncadd [#allocation4], 4294967040 }
 0x260   :  { %218 = vsyncpa [#allocation3], 1 }
 0x261   :  { %219 = vsyncpa [#allocation6], 1 }
 0x262   :  { %220 = vsyncpa [#allocation4], 1 }

</bundles_post_ra>
